<compile_context>
chip_gen: v5e
topology: v5e:2x2
jax: 0.10.0
libtpu: 0.0.40
codegen_flags: <defaults>
</compile_context>

<pallas_src>
from functools import partial

import jax
import jax.numpy as jnp
from jax import lax
from jax.experimental import pallas as pl
from jax.experimental.pallas import tpu as pltpu

NUM_CLASSES = 10
C_PAD = 128          # every channel dim is zero-padded to one lane-dense width


def _round_up(x, m):
    return (x + m - 1) // m * m


# ----------------------------------------------------------------------------
# Pallas kernels
# ----------------------------------------------------------------------------
def _gcn_layer_kernel(a_ref, x_ref, w_ref, b_ref, m_ref, o_ref, acc_ref):
    """out[r] = mask[r] * relu( (sum_k A_hat[r,k] @ X[k]) @ W + b )."""
    k = pl.program_id(1)

    @pl.when(k == 0)
    def _init():
        acc_ref[...] = jnp.zeros_like(acc_ref)

    # Neighbour aggregation: bf16 x bf16 -> f32 accumulation on the MXU.
    acc_ref[...] += jnp.dot(a_ref[...], x_ref[...],
                            preferred_element_type=jnp.float32)

    @pl.when(k == pl.num_programs(1) - 1)
    def _finalize():
        h = jnp.dot(acc_ref[...], w_ref[...],
                    preferred_element_type=jnp.float32)
        h = h + b_ref[...]
        h = jnp.maximum(h, 0.0)
        h = h * m_ref[...]                    # pre-scaled inverted dropout mask
        o_ref[...] = h.astype(o_ref.dtype)    # lane-dense bf16 store


def _head_kernel(x_ref, w_ref, b_ref, p_ref, o_ref, acc_ref, *, num_classes):
    """Linear -> scatter_mean (pooling matmul) -> log_softmax over node tiles."""
    k = pl.program_id(0)

    @pl.when(k == 0)
    def _init():
        acc_ref[...] = jnp.zeros_like(acc_ref)

    logits = jnp.dot(x_ref[...].astype(jnp.float32), w_ref[...],
                     preferred_element_type=jnp.float32) + b_ref[...]
    acc_ref[...] += jnp.dot(p_ref[...], logits,
                            preferred_element_type=jnp.float32)

    @pl.when(k == pl.num_programs(0) - 1)
    def _finalize():
        pooled = acc_ref[...]
        lane = lax.broadcasted_iota(jnp.int32, pooled.shape, 1)
        pooled = jnp.where(lane < num_classes, pooled, jnp.float32(-1e30))
        mx = jnp.max(pooled, axis=-1, keepdims=True)
        sh = pooled - mx
        lse = jnp.log(jnp.sum(jnp.exp(sh), axis=-1, keepdims=True))
        o_ref[...] = (sh - lse).astype(o_ref.dtype)


# ----------------------------------------------------------------------------
# Wrappers
# ----------------------------------------------------------------------------
def gcn_layer(a_hat, x, w, b, mask, *, tm=128, tk=128):
    n_pad = a_hat.shape[0]
    c_pad = w.shape[1]
    grid = (n_pad // tm, n_pad // tk)

    flops = 2 * n_pad * n_pad * c_pad + 2 * n_pad * c_pad * c_pad
    bytes_accessed = (a_hat.size * a_hat.dtype.itemsize          # A_hat read
                      + grid[0] * x.size * x.dtype.itemsize      # X re-read / row tile
                      + mask.size * mask.dtype.itemsize
                      + w.size * w.dtype.itemsize
                      + n_pad * c_pad * 2)                        # bf16 output

    return pl.pallas_call(
        _gcn_layer_kernel,
        out_shape=jax.ShapeDtypeStruct((n_pad, c_pad), jnp.bfloat16),
        grid_spec=pltpu.PrefetchScalarGridSpec(
            num_scalar_prefetch=0,
            grid=grid,
            in_specs=[
                pl.BlockSpec((tm, tk), lambda r, k: (r, k)),        # A_hat tile
                pl.BlockSpec((tk, c_pad), lambda r, k: (k, 0)),     # X neighbour rows
                pl.BlockSpec((c_pad, c_pad), lambda r, k: (0, 0)),  # W (resident)
                pl.BlockSpec((1, c_pad), lambda r, k: (0, 0)),      # bias (resident)
                pl.BlockSpec((tm, c_pad), lambda r, k: (r, 0)),     # dropout mask
            ],
            out_specs=pl.BlockSpec((tm, c_pad), lambda r, k: (r, 0)),
            scratch_shapes=[pltpu.VMEM((tm, c_pad), jnp.float32)],
        ),
        compiler_params=pltpu.CompilerParams(
            dimension_semantics=("parallel", "arbitrary"),
            vmem_limit_bytes=32 * 1024 * 1024,
        ),
        cost_estimate=pl.CostEstimate(flops=int(flops), transcendentals=0,
                                      bytes_accessed=int(bytes_accessed)),
    )(a_hat, x, w, b, mask)


def head(x, w_lin, b_lin, pool_mat, *, tk=128, num_classes=NUM_CLASSES):
    n_pad, c_pad = x.shape
    g_pad = pool_mat.shape[0]
    grid = (n_pad // tk,)
    return pl.pallas_call(
        partial(_head_kernel, num_classes=num_classes),
        out_shape=jax.ShapeDtypeStruct((g_pad, c_pad), jnp.float32),
        grid_spec=pltpu.PrefetchScalarGridSpec(
            num_scalar_prefetch=0,
            grid=grid,
            in_specs=[
                pl.BlockSpec((tk, c_pad), lambda k: (k, 0)),        # activations
                pl.BlockSpec((c_pad, c_pad), lambda k: (0, 0)),     # W_lin
                pl.BlockSpec((1, c_pad), lambda k: (0, 0)),         # bias
                pl.BlockSpec((g_pad, tk), lambda k: (0, k)),        # pooling matrix
            ],
            out_specs=pl.BlockSpec((g_pad, c_pad), lambda k: (0, 0)),
            scratch_shapes=[pltpu.VMEM((g_pad, c_pad), jnp.float32)],
        ),
        compiler_params=pltpu.CompilerParams(
            dimension_semantics=("arbitrary",),
            vmem_limit_bytes=32 * 1024 * 1024,
        ),
    )(x, w_lin, b_lin, pool_mat)


# ----------------------------------------------------------------------------
# Graph-structure constants (plain JAX; cacheable per-graph, not the hot path)
# ----------------------------------------------------------------------------
def gcn_norm_dense(edge_index, num_nodes):
    """A_hat = D^-1/2 (A + I) D^-1/2, PyG-style: duplicate edges summed,
    self-loops only added where missing.  Stored as A[target, source]."""
    src, dst = edge_index[0], edge_index[1]
    a = jnp.zeros((num_nodes, num_nodes), jnp.float32).at[dst, src].add(1.0)
    diag = jnp.diagonal(a)
    a = a + jnp.diag(jnp.where(diag > 0.0, 0.0, 1.0))
    deg = jnp.sum(a, axis=1)
    dinv = jnp.where(deg > 0.0, lax.rsqrt(deg), 0.0)
    return dinv[:, None] * a * dinv[None, :]


def scatter_mean_matrix(batch, num_graphs):
    onehot = (batch[None, :] == jnp.arange(num_graphs)[:, None]).astype(jnp.float32)
    counts = jnp.maximum(jnp.sum(onehot, axis=1, keepdims=True), 1.0)
    return onehot / counts


# ----------------------------------------------------------------------------
# Padding / dropout-mask helpers
# ----------------------------------------------------------------------------
def _pad_params(params, c_pad=C_PAD):
    padded = {}
    for name, v in params.items():
        if name.startswith("w"):
            buf = jnp.zeros((c_pad, c_pad), jnp.float32)
            padded[name] = buf.at[:v.shape[0], :v.shape[1]].set(v)
        else:
            buf = jnp.zeros((1, c_pad), jnp.float32)
            padded[name] = buf.at[:, :v.shape[1]].set(v)
    return padded


def _dropout_mask(key, p, shape):
    keep = jax.random.bernoulli(key, 1.0 - p, shape)
    return keep.astype(jnp.float32) * jnp.float32(1.0 / (1.0 - p))


def _prepare(params, pos, edge_index, batch, num_graphs, key, tile):
    n = pos.shape[0]
    n_pad = _round_up(max(n, tile), tile)
    g_pad = _round_up(max(num_graphs, 8), 8)

    a_hat = gcn_norm_dense(edge_index, n)
    a_pad = jnp.zeros((n_pad, n_pad), jnp.bfloat16)
    a_pad = a_pad.at[:n, :n].set(a_hat.astype(jnp.bfloat16))

    pool = scatter_mean_matrix(batch, num_graphs)
    pool_pad = jnp.zeros((g_pad, n_pad), jnp.float32).at[:num_graphs, :n].set(pool)

    x0 = jnp.zeros((n_pad, C_PAD), jnp.bfloat16)
    x0 = x0.at[:n, :pos.shape[1]].set(pos.astype(jnp.bfloat16))

    kp = _pad_params(params)

    k2, k3, k4 = jax.random.split(key, 3)
    ones = jnp.ones((n_pad, C_PAD), jnp.float32)
    masks = (ones,                                    # conv1: relu only
             _dropout_mask(k2, 0.3, (n_pad, C_PAD)),  # after relu(conv2)
             _dropout_mask(k3, 0.5, (n_pad, C_PAD)),  # after relu(conv3)
             _dropout_mask(k4, 0.5, (n_pad, C_PAD)))  # after relu(conv4)
    return a_pad, x0, masks, pool_pad, kp


# ----------------------------------------------------------------------------
# Full network forward (Pallas) + pure-JAX reference
# ----------------------------------------------------------------------------
def net_forward(params, pos, edge_index, batch, num_graphs, key, *, tile=128):
    a_pad, x, masks, pool_pad, p = _prepare(params, pos, edge_index, batch,
                                            num_graphs, key, tile)
    layers = (("w1", "b1"), ("w2", "b2"), ("w3", "b3"), ("w4", "b4"))
    for (wk, bk), m in zip(layers, masks):
        x = gcn_layer(a_pad, x, p[wk], p[bk], m, tm=tile, tk=tile)
    out = head(x, p["w_lin"], p["b_lin"], pool_pad, tk=tile)
    return out[:num_graphs, :NUM_CLASSES]


def reference_forward(params, pos, edge_index, batch, num_graphs, key, *, tile=128):
    """Pure-JAX reference with identical bf16 storage / f32 accumulation."""
    a_pad, x, masks, pool_pad, p = _prepare(params, pos, edge_index, batch,
                                            num_graphs, key, tile)
    hp = lax.Precision.HIGHEST
    a = a_pad.astype(jnp.float32)
    x = x.astype(jnp.float32)
    layers = (("w1", "b1"), ("w2", "b2"), ("w3", "b3"), ("w4", "b4"))
    for (wk, bk), m in zip(layers, masks):
        h = jnp.dot(a, x, precision=hp)
        h = jnp.dot(h, p[wk], precision=hp) + p[bk]
        h = jnp.maximum(h, 0.0) * m
        x = h.astype(jnp.bfloat16).astype(jnp.float32)
    logits = jnp.dot(x, p["w_lin"], precision=hp) + p["b_lin"]
    pooled = jnp.dot(pool_pad, logits, precision=hp)[:num_graphs, :NUM_CLASSES]
    return jax.nn.log_softmax(pooled, axis=-1)


def init_params(key):
    ks = jax.random.split(key, 5)

    def dense(k, c_in, c_out):
        scale = 1.0 / jnp.sqrt(jnp.float32(c_in))
        w = jax.random.uniform(k, (c_in, c_out), jnp.float32, -scale, scale)
        b = jnp.zeros((1, c_out), jnp.float32)
        return w, b

    w1, b1 = dense(ks[0], 3, 16)
    w2, b2 = dense(ks[1], 16, 32)
    w3, b3 = dense(ks[2], 32, 64)
    w4, b4 = dense(ks[3], 64, 64)
    w_lin, b_lin = dense(ks[4], 64, NUM_CLASSES)
    return dict(w1=w1, b1=b1, w2=w2, b2=b2, w3=w3, b3=b3, w4=w4, b4=b4,
                w_lin=w_lin, b_lin=b_lin)


if __name__ == "__main__":
    key = jax.random.PRNGKey(0)
    k_param, k_pos, k_drop = jax.random.split(key, 3)

    # Two graphs of 80 nodes each (N=160, padded to 256 -> 2x2 layer grid),
    # 3-D point positions, bidirectional ring edges inside each graph.
    n_per, G = 80, 2
    N = n_per * G
    pos = jax.random.normal(k_pos, (N, 3), jnp.float32)

    idx = jnp.arange(n_per, dtype=jnp.int32)
    srcs, dsts = [], []
    for g in range(G):
        base = g * n_per
        s = base + idx
        d = base + (idx + 1) % n_per
        srcs += [s, d]
        dsts += [d, s]
    edge_index = jnp.stack([jnp.concatenate(srcs), jnp.concatenate(dsts)])
    batch = jnp.repeat(jnp.arange(G, dtype=jnp.int32), n_per)

    params = init_params(k_param)

    out = net_forward(params, pos, edge_index, batch, num_graphs=G, key=k_drop)
    out = jax.block_until_ready(out)
    ref = reference_forward(params, pos, edge_index, batch, num_graphs=G, key=k_drop)

    assert out.shape == (G, NUM_CLASSES) and out.dtype == jnp.float32
    # log_softmax rows must sum to ~1 in probability space
    assert bool(jnp.all(jnp.abs(jnp.sum(jnp.exp(out), axis=1) - 1.0) < 1e-4))
    # match the pure-JAX reference (same bf16 storage, same dropout masks)
    assert bool(jnp.allclose(out, ref, rtol=1e-2, atol=1e-2))
    print("KERNEL_OK")
</pallas_src>

<mosaic_0001>
module attributes {stable_mosaic.version = 11 : i64} {
  func.func @_gcn_layer_kernel(%arg0: i32, %arg1: i32, %arg2: memref<128x128xbf16, #tpu.memory_space<vmem>>, %arg3: memref<128x128xbf16, #tpu.memory_space<vmem>>, %arg4: memref<128x128xf32, #tpu.memory_space<vmem>>, %arg5: memref<1x128xf32, #tpu.memory_space<vmem>>, %arg6: memref<128x128xf32, #tpu.memory_space<vmem>>, %arg7: memref<128x128xbf16, #tpu.memory_space<vmem>>, %arg8: memref<128x128xf32, #tpu.memory_space<vmem>>) attributes {dimension_semantics = [#tpu.dimension_semantics<parallel>, #tpu.dimension_semantics<arbitrary>], iteration_bounds = array<i64: 2, 2>, scalar_prefetch = 0 : i64, scratch_operands = 1 : i64, tpu.core_type = #tpu.core_type<tc>, window_params = [{transform_indices = @transform_0, window_bounds = array<i64: 128, 128>}, {transform_indices = @transform_1, window_bounds = array<i64: 128, 128>}, {pipeline_mode = #tpu.pipeline_mode<synchronous>, transform_indices = @transform_2, window_bounds = array<i64: 128, 128>}, {pipeline_mode = #tpu.pipeline_mode<synchronous>, transform_indices = @transform_3, window_bounds = array<i64: 1, 128>}, {transform_indices = @transform_4, window_bounds = array<i64: 128, 128>}, {transform_indices = @transform_5, window_bounds = array<i64: 128, 128>}]} {
    %c0_i32 = arith.constant 0 : i32
    %0 = arith.cmpi eq, %arg1, %c0_i32 : i32
    %1 = arith.extui %0 : i1 to i32
    %c0_i32_0 = arith.constant 0 : i32
    %2 = arith.cmpi ne, %1, %c0_i32_0 : i32
    scf.if %2 {
      %cst_9 = arith.constant 0.000000e+00 : f32
      %12 = vector.broadcast %cst_9 : f32 to vector<128x128xf32>
      %c0_10 = arith.constant 0 : index
      %c0_11 = arith.constant 0 : index
      %13 = vector.load %arg8[%c0_10, %c0_11] : memref<128x128xf32, #tpu.memory_space<vmem>>, vector<128x128xf32>
      tpu.vector_store %arg8[%c0_10, %c0_11], %12 {strides = array<i32>} : memref<128x128xf32, #tpu.memory_space<vmem>>, vector<128x128xf32>,
    } else {
    }
    %c0 = arith.constant 0 : index
    %c0_1 = arith.constant 0 : index
    %3 = vector.load %arg8[%c0, %c0_1] : memref<128x128xf32, #tpu.memory_space<vmem>>, vector<128x128xf32>
    %c0_2 = arith.constant 0 : index
    %c0_3 = arith.constant 0 : index
    %4 = vector.load %arg2[%c0_2, %c0_3] : memref<128x128xbf16, #tpu.memory_space<vmem>>, vector<128x128xbf16>
    %c0_4 = arith.constant 0 : index
    %c0_5 = arith.constant 0 : index
    %5 = vector.load %arg3[%c0_4, %c0_5] : memref<128x128xbf16, #tpu.memory_space<vmem>>, vector<128x128xbf16>
    %cst = arith.constant dense<0.000000e+00> : vector<128x128xf32>
    %6 = tpu.matmul %4, %5, %cst {dimension_numbers = #tpu.dot_dimension_numbers<[1], [0], [0], [1], [0, 0, 1, 1], [], []>} : vector<128x128xbf16>, vector<128x128xbf16>, vector<128x128xf32> -> vector<128x128xf32>
    %7 = arith.addf %3, %6 : vector<128x128xf32>
    %c0_6 = arith.constant 0 : index
    %c0_7 = arith.constant 0 : index
    %8 = vector.load %arg8[%c0_6, %c0_7] : memref<128x128xf32, #tpu.memory_space<vmem>>, vector<128x128xf32>
    tpu.vector_store %arg8[%c0_6, %c0_7], %7 {strides = array<i32>} : memref<128x128xf32, #tpu.memory_space<vmem>>, vector<128x128xf32>,
    %c1_i32 = arith.constant 1 : i32
    %9 = arith.cmpi eq, %arg1, %c1_i32 : i32
    %10 = arith.extui %9 : i1 to i32
    %c0_i32_8 = arith.constant 0 : i32
    %11 = arith.cmpi ne, %10, %c0_i32_8 : i32
    scf.if %11 {
      %c0_9 = arith.constant 0 : index
      %c0_10 = arith.constant 0 : index
      %12 = vector.load %arg8[%c0_9, %c0_10] : memref<128x128xf32, #tpu.memory_space<vmem>>, vector<128x128xf32>
      %c0_11 = arith.constant 0 : index
      %c0_12 = arith.constant 0 : index
      %13 = vector.load %arg4[%c0_11, %c0_12] : memref<128x128xf32, #tpu.memory_space<vmem>>, vector<128x128xf32>
      %cst_13 = arith.constant dense<0.000000e+00> : vector<128x128xf32>
      %14 = tpu.matmul %12, %13, %cst_13 {dimension_numbers = #tpu.dot_dimension_numbers<[1], [0], [0], [1], [0, 0, 1, 1], [], []>} : vector<128x128xf32>, vector<128x128xf32>, vector<128x128xf32> -> vector<128x128xf32>
      %c0_14 = arith.constant 0 : index
      %c0_15 = arith.constant 0 : index
      %15 = vector.load %arg5[%c0_14, %c0_15] : memref<1x128xf32, #tpu.memory_space<vmem>>, vector<1x128xf32>
      %16 = vector.broadcast %15 : vector<1x128xf32> to vector<128x128xf32>
      %17 = arith.addf %14, %16 : vector<128x128xf32>
      %cst_16 = arith.constant 0.000000e+00 : f32
      %18 = vector.broadcast %cst_16 : f32 to vector<128x128xf32>
      %19 = arith.maximumf %17, %18 : vector<128x128xf32>
      %c0_17 = arith.constant 0 : index
      %c0_18 = arith.constant 0 : index
      %20 = vector.load %arg6[%c0_17, %c0_18] : memref<128x128xf32, #tpu.memory_space<vmem>>, vector<128x128xf32>
      %21 = arith.mulf %19, %20 : vector<128x128xf32>
      %22 = arith.truncf %21 : vector<128x128xf32> to vector<128x128xbf16>
      %c0_19 = arith.constant 0 : index
      %c0_20 = arith.constant 0 : index
      %23 = vector.load %arg7[%c0_19, %c0_20] : memref<128x128xbf16, #tpu.memory_space<vmem>>, vector<128x128xbf16>
      tpu.vector_store %arg7[%c0_19, %c0_20], %22 {strides = array<i32>} : memref<128x128xbf16, #tpu.memory_space<vmem>>, vector<128x128xbf16>,
    } else {
    }
    return
  }
  func.func @transform_0(%arg0: i32, %arg1: i32) -> (i32, i32) {
    %c0_i32 = arith.constant 0 : i32
    return %arg0, %arg1 : i32, i32
  }
  func.func @transform_1(%arg0: i32, %arg1: i32) -> (i32, i32) {
    %c0_i32 = arith.constant 0 : i32
    %c0_i32_0 = arith.constant 0 : i32
    return %arg1, %c0_i32 : i32, i32
  }
  func.func @transform_2(%arg0: i32, %arg1: i32) -> (i32, i32) {
    %c0_i32 = arith.constant 0 : i32
    %c0_i32_0 = arith.constant 0 : i32
    %c0_i32_1 = arith.constant 0 : i32
    return %c0_i32, %c0_i32_0 : i32, i32
  }
  func.func @transform_3(%arg0: i32, %arg1: i32) -> (i32, i32) {
    %c0_i32 = arith.constant 0 : i32
    %c0_i32_0 = arith.constant 0 : i32
    %c0_i32_1 = arith.constant 0 : i32
    return %c0_i32, %c0_i32_0 : i32, i32
  }
  func.func @transform_4(%arg0: i32, %arg1: i32) -> (i32, i32) {
    %c0_i32 = arith.constant 0 : i32
    %c0_i32_0 = arith.constant 0 : i32
    return %arg0, %c0_i32 : i32, i32
  }
  func.func @transform_5(%arg0: i32, %arg1: i32) -> (i32, i32) {
    %c0_i32 = arith.constant 0 : i32
    %c0_i32_0 = arith.constant 0 : i32
    return %arg0, %c0_i32 : i32, i32
  }
}

</mosaic_0001>

<bundles_post_ra>
// kernel: tpu_custom_call.1
= control target key start
LH: loop header
LB: loop body
LE: loop exit
PB: predicated region body
PF: predicated region fallthrough
CT: control target
= control target key end

     0   :  { %s2026_s0 = inlined_call_operand.hbm [shape: bf16[256,256], index: 0, kind: input, shape index: {}]   ;;  %s2027_s1 = inlined_call_operand.hbm [shape: bf16[256,128], index: 1, kind: input, shape index: {}]   ;;  %s2028_s2 = inlined_call_operand.hbm [shape: f32[128,128], index: 2, kind: input, shape index: {}]   ;;  %s2029_s3 = inlined_call_operand.vmem [shape: f32[1,128], index: 3, kind: input, shape index: {}]   ;;  %s2030_s4 = inlined_call_operand.hbm [shape: f32[256,128], index: 4, kind: input, shape index: {}]   ;;  %s2031_s5 = inlined_call_operand.hbm [shape: bf16[256,128], index: 5, kind: output, shape index: {}]  }
   0x1   :  { %2042 = sst [smem:[#allocation25_spill]] %s2026_s0 }
   0x2   :  { %2043 = sst [smem:[#allocation26_spill]] %s2027_s1 }
   0x3   :  { %2044 = sst [smem:[#allocation27_spill]] %s2028_s2 }
   0x4   :  { %2045 = sst [smem:[#allocation28_spill]] %s2029_s3 }
   0x5   :  { %2046 = sst [smem:[#allocation29_spill]] %s2031_s5 }
   0x6   :  { %10 = vsyncpa [#allocation4], 0 }
   0x7   :  { %12 = vsyncpa [#allocation4 + $0x1], 0 }
   0x8   :  { %13 = vsyncpa [#allocation7], 0 }
   0x9   :  { %15 = vsyncpa [#allocation7 + $0x1], 0 }
   0xa   :  { %16 = vsyncpa [#allocation10], 0 }
   0xb   :  { %18 = vsyncpa [#allocation10 + $0x1], 0 }
   0xc   :  { %19 = vsyncpa [#allocation5], 0 }
   0xd   :  { %21 = vsyncpa [#allocation5 + $0x1], 0  ;;  %s1656_s18 = smov 0   ;;  %s1658_s19 = smov 0  }
   0xe   :  { %s1660_s20 = smov 0   ;;  %s1662_s21 = smov 0  }
   0xf   :  { %s1664_s22 = smov 0   ;;  %s1666_s23 = smov 0  }
  0x10   :  { %s1668_s24 = smov 0   ;;  %s1670_s25 = smov 0  }
  0x11   :  { %s1672_s26 = smov 0   ;;  %s1674_s27 = smov 0  }
  0x12   :  { %s1676_s28 = smov 0   ;;  %s1678_s29 = smov 0  }
  0x13   :  { %s1680_s30 = smov 0   ;;  %s1682_s6 = smov 0  }
  0x14 LB: > { %2047 = sst [smem:[#allocation17_spill]] %s1596_s26  ;;  %s1727_s7 = sadd.s32 4294967295, %s1616_s6   ;;  %s1616_s6 = sphi %s1682_s6, %s27_s6   ;;  %s1612_s30 = sphi %s1680_s30, %s2078_s30   ;;  %s1608_s29 = sphi %s1678_s29, %s2088_s29   ;;  %s1604_s28 = sphi %s1676_s28, %s2076_s28   ;;  %s1600_s27 = sphi %s1674_s27, %s2087_s27   ;;  %s1596_s26 = sphi %s1672_s26, %s2075_s26   ;;  %s1592_s25 = sphi %s1670_s25, %s2086_s25   ;;  %s1588_s24 = sphi %s1668_s24, %s2085_s24   ;;  %s1584_s23 = sphi %s1666_s23, %s2084_s23   ;;  %s1580_s22 = sphi %s1664_s22, %s2083_s22   ;;  %s1576_s21 = sphi %s1662_s21, %s2082_s21   ;;  %s1572_s20 = sphi %s1660_s20, %s2081_s20   ;;  %s1568_s19 = sphi %s1658_s19, %s2080_s19   ;;  %s1564_s18 = sphi %s1656_s18, %s2079_s18  }
  0x15   : > { %2048 = sst [smem:[#allocation18_spill]] %s1600_s27  ;;  %p954_p0 = scmp.ge.s32.totalorder %s1616_s6, 1 }
  0x16   : > { %2049 = sst [smem:[#allocation19_spill]] %s1604_s28  ;;  %p62_p1 = scmp.eq.s32.totalorder %s1727_s7, 0 }
  0x17   : > { %2050 = sst [smem:[#allocation20_spill]] %s1612_s30  ;;  %p192_p2 = scmp.lt.s32.totalorder %s1616_s6, 5 }
  0x18   : > { %s2051_s2 = sld [smem:[#allocation27_spill]]  ;;  %s1618_s12 = smov [#allocation8]  }
  0x19   : > { %p1735_p3 = pnand %p954_p0, %p192_p2  ;;  %s205_s13 = sshll.u32 %s1618_s12, 4  ;;  %s206_s13 = int_to_ptr.vmem [resolvable:$true] %s205_s13 }
  0x1a   : > { %s2033_s14 = smov 128   ;;  %s2032_s15 = smov 8  }
  0x1b   : > { %p1195_p4 = pneg %p1735_p3  ;;  %s36_s16 = sadd.s32 1, %s1608_s29 }
  0x1c   : > { %p37_p6 = scmp.ge.s32.totalorder %s36_s16, 2  ;;  %s39_s17 = sadd.s32 1, %s1612_s30 }
  0x1d   : > { %p1196_p5 = pnand %p1195_p4, %p62_p1  ;;  %s48_s8 = sadd.s32 1, %s1596_s26 }
  0x1e   : > { %s203_s10 = sshll.u32 %s2051_s2, 4  ;;  %p55_p7 = scmp.ne.s32.totalorder %s1596_s26, %s1592_s25  ;;  %s204_s10 = int_to_ptr.hbm [resolvable:$true] %s203_s10 }
  0x1f   : > { %1198 = dma.hbm_to_vmem [thread:$0]  (!%p1196_p5), %s204_s10, 2048, %s206_s13, [#allocation7], %s2033_s14, %s2033_s14, %s2032_s15  }
  0x20   : > { %s2090_s16 = smov (%p37_p6, %s36_s16), 0  ;;  %s2092_s17 = smov (!%p37_p6, %s39_s17), %s1612_s30 }
  0x21   : > { %2053 = sst [smem:[#allocation21_spill]] %s2090_s16  ;;  %s1756_s9 = ssub.s32 %s1608_s29, %s2090_s16 }
  0x22   : > { %p56_p8 = scmp.eq.s32.totalorder %s1616_s6, 0  ;;  %p41_p9 = scmp.ge.s32.totalorder %s2092_s17, 2 }
  0x23   : > { %p61_p10 = scmp.ne.s32.totalorder %s1592_s25, %s1588_s24  ;;  %p72_p12 = scmp.eq.s32.totalorder %s1756_s9, 0 }
  0x24   : > { %p1763_p11 = por %p56_p8, %p55_p7  ;;  %s2094_s17 = smov (%p41_p9, %s2092_s17), 0 }
  0x25   : > { %2055 = sst [smem:[#allocation22_spill]] %s2094_s17  ;;  %p1772_p13 = por %p62_p1, %p61_p10 }
  0x26   : > { %p1214_p0 = scmp.lt.s32.totalorder %s1616_s6, 4  ;;  %s1779_s13 = ssub.s32 %s1612_s30, %s2094_s17 }
  0x27   : > { %s2056_s12 = scalar_select %p1772_p13, 1, 0 }
  0x28   : > { %s222_s24 = sand.u32 1, %s1596_s26   ;;  %s45_s15 = sor.u32 %s1756_s9, %s1779_s13 }
  0x29   : > { %2057 = sst [smem:[#allocation23_spill]] %s2056_s12  ;;  %p46_p2 = scmp.eq.s32.totalorder %s45_s15, 0 }
  0x2a   : > { %s957_s14 = sshll.u32 %s222_s24, 6  ;;  %s1044_s2 = sshll.u32 %s1612_s30, 5 }
  0x2b   : > { %s1786_s16 = scalar_select %p46_p2, %s1596_s26, %s48_s8  }
  0x2c   : > { %s231_s5 = sadd.s32 %s1608_s29, %s1044_s2  ;;  %s226_s28 = scalar_lea.vmem [#allocation3], %s957_s14 }
  0x2d   : > { %2058 = sst [smem:[#allocation24_spill]] %s1786_s16  ;;  %s236_s17 = sshll.u32 %s226_s28, 4  ;;  %s237_s17 = int_to_ptr.vmem [resolvable:$true] %s236_s17 }
  0x2e   : > { %s960_s3 = sshll.u32 %s231_s5, 2  ;;  %s2059_s0 = sld [smem:[#allocation25_spill]] }
  0x2f   : > { %p1200_p4 = pnand %p1214_p0, %p1763_p11  ;;  %s223_s2 = scalar_lea.sflag [#allocation4], %s222_s24 }
  0x30   : > { %s1621_s16 = smov 64   ;;  %s1622_s14 = smov 4  }
  0x31   : > { %s2060_s26 = smov 128   ;;  %s74_s28 = sadd.s32 1, %s1584_s23 }
  0x32   : > { %s1801_s5 = scalar_select %p72_p12, %s1584_s23, %s74_s28  }
  0x33   : > { %p81_p5 = scmp.ne.s32.totalorder %s1584_s23, %s1580_s22  ;;  %p87_p6 = scmp.ne.s32.totalorder %s1580_s22, %s1576_s21 }
  0x34   : > { %s233_s12 = scalar_lea.hbm %s2059_s0, %s960_s3  ;;  %s246_s3 = sand.u32 1, %s1616_s6  }
  0x35   : > { %s234_s8 = sshll.u32 %s233_s12, 4  ;;  %s248_s27 = sand.u32 1, %s1584_s23   ;;  %s235_s8 = int_to_ptr.hbm [resolvable:$true] %s234_s8 }
  0x36   : > { %1202 = dma.hbm_to_vmem [thread:$0]  (!%p1200_p4), %s235_s8, 1024, %s237_s17, %s223_s2, %s2060_s26, %s1621_s16, %s1622_s14  }
  0x37   : > { %p83_p7 = por %p81_p5, %p56_p8  ;;  %p1813_p9 = por %p87_p6, %p62_p1 }
  0x38   : > { %s961_s17 = sshll.u32 %s248_s27, 6  ;;  %s1045_s9 = sshll.u32 %s1608_s29, 6 }
  0x39   : > { %s2062_s1 = sld [smem:[#allocation26_spill]]  ;;  %s250_s15 = scalar_lea.vmem [#allocation6], %s961_s17 }
  0x3a   : > { %s258_s8 = sshll.u32 %s250_s15, 4  ;;  %p1203_p10 = pnand %p1214_p0, %p83_p7  ;;  %s259_s8 = int_to_ptr.vmem [resolvable:$true] %s258_s8 }
  0x3b   : > { %s247_s28 = scalar_lea.sflag [#allocation7], %s246_s3  ;;  %p140_p11 = scmp.eq.s32.totalorder %s1779_s13, 0 }
  0x3c   : > { %s142_s27 = sadd.s32 1, %s1572_s20  ;;  %s953_s0 = sadd.s32 4294967294, %s1616_s6  }
  0x3d   : > { %p155_p12 = scmp.ne.s32.totalorder %s1568_s19, %s1564_s18  ;;  %p149_p2 = scmp.ne.s32.totalorder %s1572_s20, %s1568_s19 }
  0x3e   : > { %s1829_s21 = scalar_select %p140_p11, %s1572_s20, %s142_s27  }
  0x3f   : > { %s255_s24 = scalar_lea.hbm %s2062_s1, %s1045_s9  ;;  %p1835_p4 = por %p155_p12, %p62_p1 }
  0x40   : > { %s256_s2 = sshll.u32 %s255_s24, 4  ;;  %p179_p5 = scmp.eq.s32.totalorder %s1727_s7, 3  ;;  %s257_s2 = int_to_ptr.hbm [resolvable:$true] %s256_s2 }
  0x41   : > { %1205 = dma.hbm_to_vmem [thread:$0]  (!%p1203_p10), %s257_s2, 1024, %s259_s8, %s247_s28, %s1621_s16, %s1621_s16, %s1622_s14  }
  0x42   : > { %p185_p6 = scmp.eq.s32.totalorder %s953_s0, 3  ;;  %s268_s9 = sand.u32 1, %s1572_s20  }
  0x43   : > { %s1046_s12 = sshll.u32 %s1612_s30, 7  ;;  %p1842_p7 = por %p179_p5, %p149_p2 }
  0x44   : > { %p1846_p10 = por %p185_p6, %p155_p12  ;;  %p151_p11 = por %p149_p2, %p56_p8 }
  0x45   : > { %s964_s13 = sshll.u32 %s268_s9, 7  ;;  %s277_s15 = scalar_lea.hbm %s2030_s4, %s1046_s12 }
  0x46   : > { %s278_s8 = sshll.u32 %s277_s15, 4  ;;  %s272_s2 = scalar_lea.vmem [#allocation9], %s964_s13  ;;  %s279_s8 = int_to_ptr.hbm [resolvable:$true] %s278_s8 }
  0x47   : > { %s280_s0 = sshll.u32 %s272_s2, 4  ;;  %p1206_p5 = pnand %p1214_p0, %p151_p11  ;;  %s281_s0 = int_to_ptr.vmem [resolvable:$true] %s280_s0 }
  0x48   : > { %s269_s28 = scalar_lea.sflag [#allocation10], %s268_s9  ;;  %s2066_s27 = smov 8  }
  0x49   : > { %1208 = dma.hbm_to_vmem [thread:$0]  (!%p1206_p5), %s279_s8, 2048, %s281_s0, %s269_s28, %s2060_s26, %s2060_s26, %s2066_s27  }
  0x4a   : > { %292 = sbr.rel (%p1735_p3) target bundleno = 535 (0x217), region = 40  ;;  %s294_s30 = sand.u32 (!%p1735_p3), 1, %s1592_s25  }
  0x4b   : > { %s968_s14 = sshll.u32 (!%p1735_p3), %s294_s30, 6  ;;  %s295_s12 = scalar_lea.sflag (!%p1735_p3), [#allocation4], %s294_s30 }
  0x4c   : > { %s1863_s24 = scalar_lea.vmem (!%p1735_p3), [#allocation3], %s968_s14 }
  0x4f   : > { %1543 = dma.done.wait (%p1772_p13), %s295_s12, 1024  }
  0x50   : > { %1545 = vsyncadd (%p1772_p13), %s295_s12, 4294966272  ;;  %s304_s9 = sand.u32 1, %s1727_s7   ;;  %s306_s26 = sand.u32 1, %s1580_s22  }
  0x51   : > { %s969_s13 = sshll.u32 %s306_s26, 6  ;;  %s305_s11 = scalar_lea.sflag [#allocation7], %s304_s9 }
  0x52   : > { %s1871_s15 = scalar_lea.vmem [#allocation6], %s969_s13 }
  0x53   : > { %1547 = dma.done.wait (%p1813_p9), %s305_s11, 1024  }
  0x54   : > { %1549 = vsyncadd (%p1813_p9), %s305_s11, 4294966272 }
  0x55   : > { %1551 = dma.done.wait (%p62_p1), [#allocation7], 2048  }
  0x56   : > { %1553 = vsyncadd (%p62_p1), [#allocation7], 4294965248  ;;  %s1882_s1 = sand.u32 1, %s1568_s19  }
  0x57   : > { %s971_s30 = sshll.u32 %s1882_s1, 7  ;;  %s320_s8 = scalar_lea.sflag [#allocation10], %s1882_s1 }
  0x58   : > { %s1886_s2 = scalar_lea.vmem [#allocation9], %s971_s30 }
  0x59   : > { %1555 = dma.done.wait (%p1835_p4), %s320_s8, 2048  }
  0x5a   : > { %1557 = vsyncadd (%p1835_p4), %s320_s8, 4294965248  ;;  %s972_s10 = sshll.u32 %s1882_s1, 6  ;;  %s2068_s7 = sld [smem:[#allocation18_spill]] }
  0x5b   : > { %s1893_s0 = scalar_lea.vmem [#allocation11], %s972_s10 }
  0x60   : > { %p973_p1 = scmp.ne.s32.totalorder %s2068_s7, 0 }
  0x62   : > { %368 = sbr.rel (%p973_p1) target bundleno = 120 (0x78), region = 60 }
  0x67   : > { %v1623_v0 = vmov 0.0  }
  0x68   : > { %369 = vst [vmem:[#allocation2 + $0x30] sm:$0xff] %v1623_v0 }
  0x69   : > { %370 = vst [vmem:[#allocation2] sm:$0xff] %v1623_v0 }
  0x6a   : > { %371 = vst [vmem:[#allocation2 + $0x58] sm:$0xff] %v1623_v0 }
  0x6b   : > { %372 = vst [vmem:[#allocation2 + $0x18] sm:$0xff] %v1623_v0 }
  0x6c   : > { %373 = vst [vmem:[#allocation2 + $0x50] sm:$0xff] %v1623_v0 }
  0x6d   : > { %374 = vst [vmem:[#allocation2 + $0x68] sm:$0xff] %v1623_v0 }
  0x6e   : > { %375 = vst [vmem:[#allocation2 + $0x8] sm:$0xff] %v1623_v0 }
  0x6f   : > { %376 = vst [vmem:[#allocation2 + $0x48] sm:$0xff] %v1623_v0 }
  0x70   : > { %377 = vst [vmem:[#allocation2 + $0x40] sm:$0xff] %v1623_v0 }
  0x71   : > { %378 = vst [vmem:[#allocation2 + $0x20] sm:$0xff] %v1623_v0 }
  0x72   : > { %379 = vst [vmem:[#allocation2 + $0x10] sm:$0xff] %v1623_v0 }
  0x73   : > { %380 = vst [vmem:[#allocation2 + $0x38] sm:$0xff] %v1623_v0 }
  0x74   : > { %381 = vst [vmem:[#allocation2 + $0x60] sm:$0xff] %v1623_v0 }
  0x75   : > { %382 = vst [vmem:[#allocation2 + $0x70] sm:$0xff] %v1623_v0 }
  0x76   : > { %383 = vst [vmem:[#allocation2 + $0x78] sm:$0xff] %v1623_v0 }
  0x77   : > { %384 = vst [vmem:[#allocation2 + $0x28] sm:$0xff] %v1623_v0 }
  0x78 PF: > { %v1062_v1 = vld [vmem:[%s1871_s15 + $0x38] sm:$0xff]  ;;  %v1061_v2 = vld [vmem:[%s1871_s15 + $0x30] sm:$0xff]  ;;  %v1060_v3 = vld [vmem:[%s1871_s15 + $0x28] sm:$0xff]  ;;  %s2069_s17 = sld [smem:[#allocation18_spill]] }
  0x79   : > { %529 = vmatpush.bf16.msra.mxu0 %v1062_v1  ;;  %1111 = vmatpush.bf16.msra.mxu1 %v1062_v1  ;;  %v1059_v4 = vld [vmem:[%s1871_s15 + $0x20] sm:$0xff]  ;;  %v1058_v5 = vld [vmem:[%s1871_s15 + $0x18] sm:$0xff]  ;;  %v1057_v6 = vld [vmem:[%s1871_s15 + $0x10] sm:$0xff] }
  0x7a   : > { %1112 = vmatpush.bf16.msra.mxu2 %v1062_v1  ;;  %1113 = vmatpush.bf16.msra.mxu3 %v1062_v1  ;;  %v1056_v7 = vld [vmem:[%s1871_s15 + $0x8] sm:$0xff]  ;;  %v1055_v8 = vld [vmem:[%s1871_s15] sm:$0xff]  ;;  %v1049_v10 = vld [vmem:[%s1863_s24 + $0x10] sm:$0xff] }
  0x7b   : > { %v1047_v9 = vld [vmem:[%s1863_s24] sm:$0xff]  ;;  %v1053_v12 = vld [vmem:[%s1863_s24 + $0x30] sm:$0xff]  ;;  %v1048_v13 = vld [vmem:[%s1863_s24 + $0x8] sm:$0xff] }
  0x7c   : > { %v1051_v11 = vld [vmem:[%s1863_s24 + $0x20] sm:$0xff]  ;;  %v1050_v14 = vld [vmem:[%s1863_s24 + $0x18] sm:$0xff]  ;;  %v1052_v15 = vld [vmem:[%s1863_s24 + $0x28] sm:$0xff] }
  0x7d   : > { %530 = vmatpush.bf16.msra.mxu0 %v1061_v2  ;;  %1114 = vmatpush.bf16.msra.mxu1 %v1061_v2  ;;  %v1054_v16 = vld [vmem:[%s1863_s24 + $0x38] sm:$0xff]  ;;  %v385_v17 = vld [vmem:[#allocation2 + $0x30] sm:$0xff]  ;;  %v393_v23 = vld [vmem:[#allocation2 + $0x40] sm:$0xff] }
  0x7e   : > { %1115 = vmatpush.bf16.msra.mxu2 %v1061_v2  ;;  %1116 = vmatpush.bf16.msra.mxu3 %v1061_v2  ;;  %v389_v18 = vld [vmem:[#allocation2 + $0x50] sm:$0xff]  ;;  %v397_v24 = vld [vmem:[#allocation2 + $0x60] sm:$0xff]  ;;  %v390_v26 = vld [vmem:[#allocation2 + $0x68] sm:$0xff]  ;;  %p1038_p3 = scmp.ne.s32.totalorder %s2069_s17, 1 }
  0x7f   : > { %v386_v25 = vld [vmem:[#allocation2] sm:$0xff]  ;;  %v398_v36 = vld [vmem:[#allocation2 + $0x70] sm:$0xff]  ;;  %v387_v37 = vld [vmem:[#allocation2 + $0x58] sm:$0xff]  ;;  %s2070_s14 = sld [smem:[#allocation28_spill]] (!%p1038_p3) }
  0x80   : > { %v394_v35 = vld [vmem:[#allocation2 + $0x20] sm:$0xff]  ;;  %v391_v38 = vld [vmem:[#allocation2 + $0x8] sm:$0xff]  ;;  %v395_v47 = vld [vmem:[#allocation2 + $0x10] sm:$0xff] }
  0x81   : > { %531 = vmatpush.bf16.msra.mxu0 %v1060_v3  ;;  %1117 = vmatpush.bf16.msra.mxu1 %v1060_v3  ;;  %v399_v48 = vld [vmem:[#allocation2 + $0x78] sm:$0xff]  ;;  %v392_v50 = vld [vmem:[#allocation2 + $0x48] sm:$0xff] }
  0x82   : > { %1118 = vmatpush.bf16.msra.mxu2 %v1060_v3  ;;  %1119 = vmatpush.bf16.msra.mxu3 %v1060_v3  ;;  %v388_v49 = vld [vmem:[#allocation2 + $0x18] sm:$0xff]  ;;  %v400_v60 = vld [vmem:[#allocation2 + $0x28] sm:$0xff] }
  0x83   : > { %v396_v59 = vld [vmem:[#allocation2 + $0x38] sm:$0xff] }
  0x85   : > { %532 = vmatpush.bf16.msra.mxu0 %v1059_v4  ;;  %1120 = vmatpush.bf16.msra.mxu1 %v1059_v4 }
  0x86   : > { %1121 = vmatpush.bf16.msra.mxu2 %v1059_v4  ;;  %1122 = vmatpush.bf16.msra.mxu3 %v1059_v4 }
  0x89   : > { %533 = vmatpush.bf16.msra.mxu0 %v1058_v5  ;;  %1123 = vmatpush.bf16.msra.mxu1 %v1058_v5 }
  0x8a   : > { %1124 = vmatpush.bf16.msra.mxu2 %v1058_v5  ;;  %1125 = vmatpush.bf16.msra.mxu3 %v1058_v5 }
  0x8d   : > { %534 = vmatpush.bf16.msra.mxu0 %v1057_v6  ;;  %1126 = vmatpush.bf16.msra.mxu1 %v1057_v6 }
  0x8e   : > { %1127 = vmatpush.bf16.msra.mxu2 %v1057_v6  ;;  %1128 = vmatpush.bf16.msra.mxu3 %v1057_v6 }
  0x91   : > { %535 = vmatpush.bf16.msra.mxu0 %v1056_v7  ;;  %1129 = vmatpush.bf16.msra.mxu1 %v1056_v7 }
  0x92   : > { %1130 = vmatpush.bf16.msra.mxu2 %v1056_v7  ;;  %1131 = vmatpush.bf16.msra.mxu3 %v1056_v7 }
  0x95   : > { %536 = vmatpush.bf16.msra.mxu0 %v1055_v8  ;;  %1132 = vmatpush.bf16.msra.mxu1 %v1055_v8 }
  0x96   : > { %1133 = vmatpush.bf16.msra.mxu2 %v1055_v8  ;;  %1134 = vmatpush.bf16.msra.mxu3 %v1055_v8 }
  0x98   : > { %537 = vmatmul.bf16.vlgmr.msra.gmra.mxu0 %v1047_v9  ;;  %547 = vmatmul.bf16.vlgmr.msra.gmra.mxu1 %v1049_v10 }
  0x99   : > { %557 = vmatmul.bf16.vlgmr.msra.gmra.mxu2 %v1051_v11  ;;  %567 = vmatmul.bf16.vlgmr.msra.gmra.mxu3 %v1053_v12 }
  0xa8   : > { %542 = vmatmul.bf16.gmra.mxu0 %v1048_v13  ;;  %552 = vmatmul.bf16.gmra.mxu1 %v1050_v14 }
  0xa9   : > { %562 = vmatmul.bf16.gmra.mxu2 %v1052_v15  ;;  %572 = vmatmul.bf16.gmra.mxu3 %v1054_v16 }
 0x115   : > { %v538_v19 = vpop.f32.mrf.mxu0  ;;  %v548_v20 = vpop.f32.mrf.mxu1 }
 0x116   : > { %v578_v21 = vadd.f32 %v538_v19, %v385_v17  ;;  %v582_v22 = vadd.f32 %v548_v20, %v389_v18 }
 0x118   : > { %594 = vst [vmem:[#allocation2 + $0x30] sm:$0xff] %v578_v21 }
 0x119   : > { %598 = vst [vmem:[#allocation2 + $0x50] sm:$0xff] %v582_v22 }
 0x11c   : > { %v558_v27 = vpop.f32.mrf.mxu2  ;;  %v568_v28 = vpop.f32.mrf.mxu3 }
 0x11d   : > { %v586_v29 = vadd.f32 %v558_v27, %v393_v23  ;;  %v590_v30 = vadd.f32 %v568_v28, %v397_v24  ;;  %v540_v31 = vpop.f32.mrf.mxu0  ;;  %v550_v32 = vpop.f32.mrf.mxu1 }
 0x11e   : > { %v579_v33 = vadd.f32 %v540_v31, %v386_v25  ;;  %v583_v34 = vadd.f32 %v550_v32, %v390_v26 }
 0x11f   : > { %602 = vst [vmem:[#allocation2 + $0x40] sm:$0xff] %v586_v29 }
 0x120   : > { %606 = vst [vmem:[#allocation2 + $0x60] sm:$0xff] %v590_v30 }
 0x121   : > { %595 = vst [vmem:[#allocation2] sm:$0xff] %v579_v33 }
 0x122   : > { %599 = vst [vmem:[#allocation2 + $0x68] sm:$0xff] %v583_v34 }
 0x124   : > { %v560_v39 = vpop.f32.mrf.mxu2  ;;  %v570_v40 = vpop.f32.mrf.mxu3 }
 0x125   : > { %v587_v41 = vadd.f32 %v560_v39, %v394_v35  ;;  %v591_v42 = vadd.f32 %v570_v40, %v398_v36  ;;  %v543_v43 = vpop.f32.mrf.mxu0  ;;  %v553_v44 = vpop.f32.mrf.mxu1 }
 0x126   : > { %v580_v45 = vadd.f32 %v543_v43, %v387_v37  ;;  %v584_v46 = vadd.f32 %v553_v44, %v391_v38 }
 0x127   : > { %603 = vst [vmem:[#allocation2 + $0x20] sm:$0xff] %v587_v41 }
 0x128   : > { %607 = vst [vmem:[#allocation2 + $0x70] sm:$0xff] %v591_v42 }
 0x129   : > { %596 = vst [vmem:[#allocation2 + $0x58] sm:$0xff] %v580_v45 }
 0x12a   : > { %600 = vst [vmem:[#allocation2 + $0x8] sm:$0xff] %v584_v46 }
 0x12c   : > { %v563_v51 = vpop.f32.mrf.mxu2  ;;  %v573_v52 = vpop.f32.mrf.mxu3 }
 0x12d   : > { %v588_v53 = vadd.f32 %v563_v51, %v395_v47  ;;  %v592_v54 = vadd.f32 %v573_v52, %v399_v48  ;;  %v545_v55 = vpop.f32.mrf.mxu0  ;;  %v555_v56 = vpop.f32.mrf.mxu1 }
 0x12e   : > { %v581_v57 = vadd.f32 %v545_v55, %v388_v49  ;;  %v585_v58 = vadd.f32 %v555_v56, %v392_v50 }
 0x12f   : > { %604 = vst [vmem:[#allocation2 + $0x10] sm:$0xff] %v588_v53 }
 0x130   : > { %608 = vst [vmem:[#allocation2 + $0x78] sm:$0xff] %v592_v54 }
 0x131   : > { %597 = vst [vmem:[#allocation2 + $0x18] sm:$0xff] %v581_v57 }
 0x132   : > { %601 = vst [vmem:[#allocation2 + $0x48] sm:$0xff] %v585_v58 }
 0x134   : > { %v565_v61 = vpop.f32.mrf.mxu2  ;;  %v575_v62 = vpop.f32.mrf.mxu3  ;;  %613 = sbr.rel (%p1038_p3) target bundleno = 513 (0x201), region = 64 }
 0x135   : > { %v589_v63 = vadd.f32 %v565_v61, %v396_v59  ;;  %v593_v0 = vadd.f32 %v575_v62, %v400_v60 }
 0x137   : > { %605 = vst [vmem:[#allocation2 + $0x38] sm:$0xff] %v589_v63 }
 0x138   : > { %609 = vst [vmem:[#allocation2 + $0x28] sm:$0xff] %v593_v0 }
 0x139   : > { %v645_v1 = vld [vmem:[#allocation8 + $0x78] sm:$0xff]  ;;  %v644_v2 = vld [vmem:[#allocation8 + $0x70] sm:$0xff]  ;;  %v643_v3 = vld [vmem:[#allocation8 + $0x68] sm:$0xff] }
 0x13a   : > { %650 = vmatpush.msra.mxu0 %v645_v1  ;;  %1135 = vmatpush.msra.mxu1 %v645_v1  ;;  %v642_v4 = vld [vmem:[#allocation8 + $0x60] sm:$0xff]  ;;  %v641_v5 = vld [vmem:[#allocation8 + $0x58] sm:$0xff]  ;;  %v640_v6 = vld [vmem:[#allocation8 + $0x50] sm:$0xff] }
 0x13b   : > { %1136 = vmatpush.msra.mxu2 %v645_v1  ;;  %1137 = vmatpush.msra.mxu3 %v645_v1  ;;  %v639_v7 = vld [vmem:[#allocation8 + $0x48] sm:$0xff]  ;;  %v638_v8 = vld [vmem:[#allocation8 + $0x40] sm:$0xff]  ;;  %v637_v9 = vld [vmem:[#allocation8 + $0x38] sm:$0xff] }
 0x13c   : > { %651 = vmatpush.msra.mxu0 %v644_v2  ;;  %1138 = vmatpush.msra.mxu1 %v644_v2  ;;  %v636_v10 = vld [vmem:[#allocation8 + $0x30] sm:$0xff]  ;;  %v635_v11 = vld [vmem:[#allocation8 + $0x28] sm:$0xff]  ;;  %v634_v12 = vld [vmem:[#allocation8 + $0x20] sm:$0xff] }
 0x13d   : > { %1139 = vmatpush.msra.mxu2 %v644_v2  ;;  %1140 = vmatpush.msra.mxu3 %v644_v2  ;;  %v633_v13 = vld [vmem:[#allocation8 + $0x18] sm:$0xff]  ;;  %v632_v14 = vld [vmem:[#allocation8 + $0x10] sm:$0xff]  ;;  %v631_v15 = vld [vmem:[#allocation8 + $0x8] sm:$0xff] }
 0x13e   : > { %652 = vmatpush.msra.mxu0 %v643_v3  ;;  %1141 = vmatpush.msra.mxu1 %v643_v3  ;;  %v630_v16 = vld [vmem:[#allocation8] sm:$0xff]  ;;  %v614_v17 = vld [vmem:[#allocation2 + $0x30] sm:$0xff]  ;;  %v619_v22 = vld [vmem:[#allocation2 + $0x68] sm:$0xff] }
 0x13f   : > { %1142 = vmatpush.msra.mxu2 %v643_v3  ;;  %1143 = vmatpush.msra.mxu3 %v643_v3  ;;  %v618_v18 = vld [vmem:[#allocation2 + $0x50] sm:$0xff]  ;;  %v622_v19 = vld [vmem:[#allocation2 + $0x40] sm:$0xff]  ;;  %v616_v25 = vld [vmem:[#allocation2 + $0x58] sm:$0xff] }
 0x140   : > { %653 = vmatpush.msra.mxu0 %v642_v4  ;;  %1144 = vmatpush.msra.mxu1 %v642_v4  ;;  %v626_v20 = vld [vmem:[#allocation2 + $0x60] sm:$0xff]  ;;  %v627_v24 = vld [vmem:[#allocation2 + $0x70] sm:$0xff]  ;;  %v620_v26 = vld [vmem:[#allocation2 + $0x8] sm:$0xff] }
 0x141   : > { %1145 = vmatpush.msra.mxu2 %v642_v4  ;;  %1146 = vmatpush.msra.mxu3 %v642_v4  ;;  %v615_v21 = vld [vmem:[#allocation2] sm:$0xff]  ;;  %v624_v27 = vld [vmem:[#allocation2 + $0x10] sm:$0xff]  ;;  %v628_v28 = vld [vmem:[#allocation2 + $0x78] sm:$0xff] }
 0x142   : > { %654 = vmatpush.msra.mxu0 %v641_v5  ;;  %1147 = vmatpush.msra.mxu1 %v641_v5  ;;  %v623_v23 = vld [vmem:[#allocation2 + $0x20] sm:$0xff]  ;;  %v617_v29 = vld [vmem:[#allocation2 + $0x18] sm:$0xff]  ;;  %v621_v30 = vld [vmem:[#allocation2 + $0x48] sm:$0xff] }
 0x143   : > { %1148 = vmatpush.msra.mxu2 %v641_v5  ;;  %1149 = vmatpush.msra.mxu3 %v641_v5  ;;  %v625_v31 = vld [vmem:[#allocation2 + $0x38] sm:$0xff]  ;;  %v629_v32 = vld [vmem:[#allocation2 + $0x28] sm:$0xff]  ;;  %v1916_v35 = vld [vmem:[%s2070_s14] ss:$0 sm:$0xff] }
 0x144   : > { %655 = vmatpush.msra.mxu0 %v640_v6  ;;  %1150 = vmatpush.msra.mxu1 %v640_v6  ;;  %v731_v43 = vld [vmem:[%s1886_s2] sm:$0xff]  ;;  %v732_v48 = vld [vmem:[%s1886_s2 + $0x8] sm:$0xff] }
 0x145   : > { %1151 = vmatpush.msra.mxu2 %v640_v6  ;;  %1152 = vmatpush.msra.mxu3 %v640_v6  ;;  %v735_v47 = vld [vmem:[%s1886_s2 + $0x20] sm:$0xff]  ;;  %v736_v49 = vld [vmem:[%s1886_s2 + $0x28] sm:$0xff] }
 0x146   : > { %656 = vmatpush.msra.mxu0 %v639_v7  ;;  %1153 = vmatpush.msra.mxu1 %v639_v7  ;;  %v739_v63 = vld [vmem:[%s1886_s2 + $0x40] sm:$0xff]  ;;  %v740_v6 = vld [vmem:[%s1886_s2 + $0x48] sm:$0xff] }
 0x147   : > { %1154 = vmatpush.msra.mxu2 %v639_v7  ;;  %1155 = vmatpush.msra.mxu3 %v639_v7  ;;  %v743_v5 = vld [vmem:[%s1886_s2 + $0x60] sm:$0xff]  ;;  %v744_v7 = vld [vmem:[%s1886_s2 + $0x68] sm:$0xff] }
 0x148   : > { %657 = vmatpush.msra.mxu0 %v638_v8  ;;  %1156 = vmatpush.msra.mxu1 %v638_v8 }
 0x149   : > { %1157 = vmatpush.msra.mxu2 %v638_v8  ;;  %1158 = vmatpush.msra.mxu3 %v638_v8 }
 0x14a   : > { %658 = vmatpush.msra.mxu0 %v637_v9  ;;  %1159 = vmatpush.msra.mxu1 %v637_v9 }
 0x14b   : > { %1160 = vmatpush.msra.mxu2 %v637_v9  ;;  %1161 = vmatpush.msra.mxu3 %v637_v9 }
 0x14c   : > { %659 = vmatpush.msra.mxu0 %v636_v10  ;;  %1162 = vmatpush.msra.mxu1 %v636_v10 }
 0x14d   : > { %1163 = vmatpush.msra.mxu2 %v636_v10  ;;  %1164 = vmatpush.msra.mxu3 %v636_v10 }
 0x14e   : > { %660 = vmatpush.msra.mxu0 %v635_v11  ;;  %1165 = vmatpush.msra.mxu1 %v635_v11 }
 0x14f   : > { %1166 = vmatpush.msra.mxu2 %v635_v11  ;;  %1167 = vmatpush.msra.mxu3 %v635_v11 }
 0x150   : > { %661 = vmatpush.msra.mxu0 %v634_v12  ;;  %1168 = vmatpush.msra.mxu1 %v634_v12 }
 0x151   : > { %1169 = vmatpush.msra.mxu2 %v634_v12  ;;  %1170 = vmatpush.msra.mxu3 %v634_v12 }
 0x152   : > { %662 = vmatpush.msra.mxu0 %v633_v13  ;;  %1171 = vmatpush.msra.mxu1 %v633_v13 }
 0x153   : > { %1172 = vmatpush.msra.mxu2 %v633_v13  ;;  %1173 = vmatpush.msra.mxu3 %v633_v13 }
 0x154   : > { %663 = vmatpush.msra.mxu0 %v632_v14  ;;  %1174 = vmatpush.msra.mxu1 %v632_v14 }
 0x155   : > { %1175 = vmatpush.msra.mxu2 %v632_v14  ;;  %1176 = vmatpush.msra.mxu3 %v632_v14 }
 0x156   : > { %664 = vmatpush.msra.mxu0 %v631_v15  ;;  %1177 = vmatpush.msra.mxu1 %v631_v15 }
 0x157   : > { %1178 = vmatpush.msra.mxu2 %v631_v15  ;;  %1179 = vmatpush.msra.mxu3 %v631_v15 }
 0x158   : > { %665 = vmatpush.msra.mxu0 %v630_v16  ;;  %1180 = vmatpush.msra.mxu1 %v630_v16 }
 0x159   : > { %1181 = vmatpush.msra.mxu2 %v630_v16  ;;  %1182 = vmatpush.msra.mxu3 %v630_v16 }
 0x15a   : > { %666 = vmatmul.f32.vlgmr.msra.gmra.mxu0 %v614_v17  ;;  %678 = vmatmul.f32.vlgmr.msra.gmra.mxu1 %v618_v18 }
 0x15b   : > { %690 = vmatmul.f32.vlgmr.msra.gmra.mxu2 %v622_v19  ;;  %702 = vmatmul.f32.vlgmr.msra.gmra.mxu3 %v626_v20 }
 0x162   : > { %669 = vmatmul.f32.gmra.mxu0 %v615_v21  ;;  %681 = vmatmul.f32.gmra.mxu1 %v619_v22 }
 0x163   : > { %693 = vmatmul.f32.gmra.mxu2 %v623_v23  ;;  %705 = vmatmul.f32.gmra.mxu3 %v627_v24  ;;  %v733_v23 = vld [vmem:[%s1886_s2 + $0x10] sm:$0xff] }
 0x16a   : > { %672 = vmatmul.f32.gmra.mxu0 %v616_v25  ;;  %684 = vmatmul.f32.gmra.mxu1 %v620_v26 }
 0x16b   : > { %696 = vmatmul.f32.gmra.mxu2 %v624_v27  ;;  %708 = vmatmul.f32.gmra.mxu3 %v628_v28  ;;  %v737_v27 = vld [vmem:[%s1886_s2 + $0x30] sm:$0xff]  ;;  %v734_v28 = vld [vmem:[%s1886_s2 + $0x18] sm:$0xff] }
 0x172   : > { %675 = vmatmul.f32.gmra.mxu0 %v617_v29  ;;  %687 = vmatmul.f32.gmra.mxu1 %v621_v30  ;;  %v738_v29 = vld [vmem:[%s1886_s2 + $0x38] sm:$0xff] }
 0x173   : > { %699 = vmatmul.f32.gmra.mxu2 %v625_v31  ;;  %711 = vmatmul.f32.gmra.mxu3 %v629_v32 }
 0x1d7   : > { %v667_v33 = vpop.f32.mrf.mxu0  ;;  %v679_v34 = vpop.f32.mrf.mxu1 }
 0x1d8   : > { %v668_v36 = vadd.f32 %v1916_v35, %v667_v33  ;;  %v680_v37 = vadd.f32 %v1916_v35, %v679_v34 }
 0x1da   : > { %v715_v42 = vmax.f32 %v668_v36, 0.0  ;;  %v719_v44 = vmax.f32 %v680_v37, 0.0 }
 0x1dc   : > { %v747_v54 = vmul.f32 %v731_v43, %v715_v42  ;;  %v751_v55 = vmul.f32 %v735_v47, %v719_v44  ;;  %v741_v44 = vld [vmem:[%s1886_s2 + $0x50] sm:$0xff] }
 0x1de   : > { %v691_v38 = vpop.f32.mrf.mxu2  ;;  %v703_v39 = vpop.f32.mrf.mxu3 }
 0x1df   : > { %v670_v40 = vpop.f32.mrf.mxu0  ;;  %v682_v41 = vpop.f32.mrf.mxu1  ;;  %v692_v52 = vadd.f32 %v1916_v35, %v691_v38  ;;  %v704_v53 = vadd.f32 %v1916_v35, %v703_v39 }
 0x1e0   : > { %v671_v45 = vadd.f32 %v1916_v35, %v670_v40  ;;  %v683_v46 = vadd.f32 %v1916_v35, %v682_v41 }
 0x1e1   : > { %v723_v62 = vmax.f32 %v692_v52, 0.0  ;;  %v727_v0 = vmax.f32 %v704_v53, 0.0 }
 0x1e2   : > { %v716_v50 = vmax.f32 %v671_v45, 0.0  ;;  %v720_v51 = vmax.f32 %v683_v46, 0.0 }
 0x1e3   : > { %v755_v10 = vmul.f32 %v739_v63, %v723_v62  ;;  %v759_v11 = vmul.f32 %v743_v5, %v727_v0 }
 0x1e4   : > { %v748_v56 = vmul.f32 %v732_v48, %v716_v50  ;;  %v752_v57 = vmul.f32 %v736_v49, %v720_v51  ;;  %v745_v48 = vld [vmem:[%s1886_s2 + $0x70] sm:$0xff]  ;;  %v742_v49 = vld [vmem:[%s1886_s2 + $0x58] sm:$0xff] }
 0x1e5   : > { %v746_v50 = vld [vmem:[%s1886_s2 + $0x78] sm:$0xff] }
 0x1e6   : > { %v1067_v58 = vpack.c.bf16 %v748_v56, %v747_v54  ;;  %v1077_v59 = vpack.c.bf16 %v752_v57, %v751_v55  ;;  %v694_v60 = vpop.f32.mrf.mxu2  ;;  %v706_v61 = vpop.f32.mrf.mxu3 }
 0x1e7   : > { %v695_v1 = vadd.f32 %v1916_v35, %v694_v60  ;;  %v707_v2 = vadd.f32 %v1916_v35, %v706_v61  ;;  %v673_v3 = vpop.f32.mrf.mxu0  ;;  %v685_v4 = vpop.f32.mrf.mxu1 }
 0x1e8   : > { %1068 = vst [vmem:[%s1893_s0] sm:$0xff] %v1067_v58   ;;  %v674_v14 = vadd.f32 %v1916_v35, %v673_v3  ;;  %v686_v15 = vadd.f32 %v1916_v35, %v685_v4 }
 0x1e9   : > { %1105 = vst [vmem:[%s1893_s0 + $0x10] sm:$0xff] %v1077_v59   ;;  %v724_v8 = vmax.f32 %v695_v1, 0.0  ;;  %v728_v9 = vmax.f32 %v707_v2, 0.0 }
 0x1ea   : > { %v717_v22 = vmax.f32 %v674_v14, 0.0  ;;  %v721_v24 = vmax.f32 %v686_v15, 0.0 }
 0x1eb   : > { %v756_v12 = vmul.f32 %v740_v6, %v724_v8  ;;  %v760_v13 = vmul.f32 %v744_v7, %v728_v9 }
 0x1ec   : > { %v749_v34 = vmul.f32 %v733_v23, %v717_v22  ;;  %v753_v36 = vmul.f32 %v737_v27, %v721_v24 }
 0x1ed   : > { %v1087_v16 = vpack.c.bf16 %v756_v12, %v755_v10  ;;  %v1097_v17 = vpack.c.bf16 %v760_v13, %v759_v11 }
 0x1ee   : > { %v697_v18 = vpop.f32.mrf.mxu2  ;;  %v709_v19 = vpop.f32.mrf.mxu3 }
 0x1ef   : > { %1107 = vst [vmem:[%s1893_s0 + $0x20] sm:$0xff] %v1087_v16   ;;  %v676_v20 = vpop.f32.mrf.mxu0  ;;  %v688_v21 = vpop.f32.mrf.mxu1  ;;  %v698_v32 = vadd.f32 %v1916_v35, %v697_v18  ;;  %v710_v33 = vadd.f32 %v1916_v35, %v709_v19 }
 0x1f0   : > { %1109 = vst [vmem:[%s1893_s0 + $0x30] sm:$0xff] %v1097_v17   ;;  %v677_v25 = vadd.f32 %v1916_v35, %v676_v20  ;;  %v689_v26 = vadd.f32 %v1916_v35, %v688_v21 }
 0x1f1   : > { %v725_v43 = vmax.f32 %v698_v32, 0.0  ;;  %v729_v45 = vmax.f32 %v710_v33, 0.0 }
 0x1f2   : > { %v718_v30 = vmax.f32 %v677_v25, 0.0  ;;  %v722_v31 = vmax.f32 %v689_v26, 0.0 }
 0x1f3   : > { %v757_v53 = vmul.f32 %v741_v44, %v725_v43  ;;  %v761_v54 = vmul.f32 %v745_v48, %v729_v45 }
 0x1f4   : > { %v750_v37 = vmul.f32 %v734_v28, %v718_v30  ;;  %v754_v38 = vmul.f32 %v738_v29, %v722_v31 }
 0x1f6   : > { %v1072_v39 = vpack.c.bf16 %v750_v37, %v749_v34  ;;  %v1082_v40 = vpack.c.bf16 %v754_v38, %v753_v36  ;;  %v700_v41 = vpop.f32.mrf.mxu2  ;;  %v712_v42 = vpop.f32.mrf.mxu3 }
 0x1f7   : > { %v701_v46 = vadd.f32 %v1916_v35, %v700_v41  ;;  %v713_v47 = vadd.f32 %v1916_v35, %v712_v42 }
 0x1f8   : > { %1104 = vst [vmem:[%s1893_s0 + $0x8] sm:$0xff] %v1072_v39  }
 0x1f9   : > { %1106 = vst [vmem:[%s1893_s0 + $0x18] sm:$0xff] %v1082_v40   ;;  %v726_v51 = vmax.f32 %v701_v46, 0.0  ;;  %v730_v52 = vmax.f32 %v713_v47, 0.0 }
 0x1fb   : > { %v758_v55 = vmul.f32 %v742_v49, %v726_v51  ;;  %v762_v56 = vmul.f32 %v746_v50, %v730_v52 }
 0x1fd   : > { %v1092_v57 = vpack.c.bf16 %v758_v55, %v757_v53  ;;  %v1102_v58 = vpack.c.bf16 %v762_v56, %v761_v54 }
 0x1ff   : > { %1108 = vst [vmem:[%s1893_s0 + $0x28] sm:$0xff] %v1092_v57  }
 0x200   : > { %1110 = vst [vmem:[%s1893_s0 + $0x38] sm:$0xff] %v1102_v58  }
 0x201 PF: > { %s2071_s12 = sld [smem:[#allocation19_spill]]  ;;  %s808_s15 = sshll.u32 %s1893_s0, 4  ;;  %s809_s15 = int_to_ptr.vmem [resolvable:$true] %s808_s15 }
 0x202   : > { %s2072_s13 = sld [smem:[#allocation29_spill]]  ;;  %s796_s8 = scalar_lea.sflag [#allocation5], %s1882_s1 }
 0x207   : > { %s1063_s24 = sshll.u32 %s2071_s12, 6 }
 0x208   : > { %s807_s11 = scalar_lea.hbm %s2072_s13, %s1063_s24  ;;  %s1478_s28 = scalar_lea.hbm %s2072_s13, 128 }
 0x209   : > { %s810_s30 = sshll.u32 %s807_s11, 4  ;;  %s811_s30 = int_to_ptr.hbm [resolvable:$true] %s810_s30 }
 0x20a   : > { %s1472_s2 = sshra.s32 %s811_s30, 4  ;;  %s1473_s2 = int_to_ptr.hbm [resolvable:$true] %s1472_s2 }
 0x20b   : > { %s1474_s10 = scalar_lea.hbm %s1473_s2, 64  ;;  %p1479_p9 = scmp.lt.s32.totalorder %s1473_s2, %s2072_s13 }
 0x20c   : > { %p1475_p8 = scmp.ne.s32.totalorder %s1473_s2, %s1474_s10  ;;  %p1480_p12 = scmp.lt.s32.totalorder %s1478_s28, %s1474_s10 }
 0x20e   : > { %p1476_p13 = pnand %p1475_p8, %p1842_p7  ;;  %p1481_p2 = por %p1480_p12, %p1479_p9 }
 0x210   : > { %p1477_p0 = pneg %p1476_p13 }
 0x212   : > { %p1482_p4 = pnand %p1481_p2, %p1477_p0 }
 0x214   : > { %1485 = shalt.err (!%p1482_p4)
}
 0x215   : > { %s1624_s1 = smov 64   ;;  %s1625_s0 = smov 4  }
 0x216   : > { %1193 = dma.vmem_to_hbm [thread:$0]  (%p1842_p7), %s809_s15, 1024, %s811_s30, %s796_s8, %s1624_s1, %s1624_s1, %s1625_s0  }
 0x217 PF: > { %p1216_p6 = scmp.ge.s32.totalorder %s1616_s6, 2  ;;  %s825_s12 = sand.u32 1, %s1564_s18  }
 0x218   : > { %s826_s24 = scalar_lea.sflag [#allocation5], %s825_s12 }
 0x219   : > { %p1210_p11 = pnand %p1216_p6, %p1846_p10 }
 0x21b   : > { %p1211_p5 = pneg %p1210_p11 }
 0x21d   : > { %1559 = dma.done.wait (%p1211_p5), %s826_s24, 1024  }
 0x21e   : > { %1561 = vsyncadd (%p1211_p5), %s826_s24, 4294966272  ;;  %s27_s6 = sadd.s32 1, %s1616_s6   ;;  %s2074_s3 = sld [smem:[#allocation17_spill]] }
 0x21f   : > { %p1979_p1 = scmp.ge.s32.totalorder %s27_s6, 6   ;;  %s2075_s26 = sld [smem:[#allocation24_spill]] }
 0x220   : > { %s2076_s28 = sld [smem:[#allocation20_spill]]  ;;  %s2079_s18 = smov %s1568_s19 }
 0x221   : > { %s2077_s16 = sld [smem:[#allocation21_spill]]  ;;  %s2080_s19 = smov %s1572_s20 }
 0x222   : > { %s2078_s30 = sld [smem:[#allocation22_spill]]  ;;  %s2081_s20 = smov %s1829_s21 }
 0x223   : > { %s2082_s21 = smov %s1580_s22  ;;  %s2083_s22 = smov %s1584_s23 }
 0x224   : > { %s2084_s23 = smov %s1801_s5  ;;  %s2085_s24 = smov %s1592_s25 }
 0x225   : > { %s2086_s25 = smov %s2074_s3  ;;  %s2087_s27 = smov %s1608_s29 }
 0x226   :  { %26 = sbr.rel (!%p1979_p1) target bundleno = 20 (0x14), region = 123 }
 0x227   : > { %s2088_s29 = smov %s2077_s16 }
 0x22b   :  { %832 = vsyncpa [#allocation4], 1 }
 0x22c   :  { %834 = vsyncpa [#allocation4 + $0x1], 1 }
 0x22d   :  { %835 = vsyncpa [#allocation7], 1 }
 0x22e   :  { %837 = vsyncpa [#allocation7 + $0x1], 1 }
 0x22f   :  { %838 = vsyncpa [#allocation10], 1 }
 0x230   :  { %840 = vsyncpa [#allocation10 + $0x1], 1 }
 0x231   :  { %841 = vsyncpa [#allocation5], 1 }
 0x232   :  { %843 = vsyncpa [#allocation5 + $0x1], 1 }

</bundles_post_ra>
